<compile_context>
chip_gen: v7x
topology: tpu7x:2x2x1
jax: 0.10.0
libtpu: 0.0.40
codegen_flags: <defaults>
</compile_context>

<pallas_src>
import math

import jax
import jax.numpy as jnp
from jax.experimental import pallas as pl
from jax.experimental.pallas import tpu as pltpu


# --------------------------------------------------------------------------
# Kernel 1: pseudoinput generation.
#   pseudoinputs = clip(W, 0, 1)  with W stored lane-dense as (K, D).
#   (The reference's idle_input @ W^T identity matmul is folded away; no MXU,
#    no grid -- a single whole-array VPU clamp, computed once and cached.)
# --------------------------------------------------------------------------
def _pseudoinputs_kernel(w_ref, out_ref):
    # nn.Hardtanh(min_val=0.0, max_val=1.0)
    out_ref[...] = jnp.clip(w_ref[...], 0.0, 1.0).astype(out_ref.dtype)


def pseudoinputs(w_kd):
    """w_kd: (number_components, prod(input_size)) float32, lane-dense."""
    K, D = w_kd.shape
    return pl.pallas_call(
        _pseudoinputs_kernel,
        out_shape=jax.ShapeDtypeStruct((K, D), jnp.float32),
    )(w_kd)


# --------------------------------------------------------------------------
# Kernel 2: reparameterization trick (training branch).
#   z = mu + eps * exp(0.5 * logvar)
# --------------------------------------------------------------------------
def _uniform01(shape):
    """Uniform [0, 1) from raw PRNG bits (exponent trick, no int->float cvt)."""
    bits = pltpu.prng_random_bits(shape)
    if bits.dtype != jnp.uint32:
        bits = pltpu.bitcast(bits, jnp.uint32)
    mant = (bits >> jnp.uint32(9)) | jnp.uint32(0x3F800000)   # [1, 2)
    return pltpu.bitcast(mant, jnp.float32) - 1.0             # [0, 1)


def _reparam_hw_kernel(seed_ref, mu_ref, logvar_ref, out_ref):
    """TPU (Mosaic) path: eps drawn in-kernel so only mu/logvar/z hit HBM.

    Two-word seeding (seed, program_id) avoids the (seed+1, block-1) aliasing
    a summed seed would produce across training steps, and keeps streams
    independent per grid step / TensorCore.
    """
    pltpu.prng_seed(seed_ref[0], pl.program_id(0))
    tb, d = mu_ref.shape

    # Box-Muller using BOTH outputs: draw uniforms at half resolution, compute
    # r = sqrt(-2 ln u1) once, emit [r*cos ; r*sin] along the sublane axis.
    # Halves the PRNG/bit-twiddle work and cuts transcendentals/elem 4 -> 2.5.
    if tb % 2 == 0:
        half = tb // 2
        u1 = 1.0 - _uniform01((half, d))              # (0, 1] -> log finite
        u2 = _uniform01((half, d))                    # [0, 1)
        r = jnp.sqrt(-2.0 * jnp.log(u1))
        theta = (2.0 * math.pi) * u2
        eps = jnp.concatenate([r * jnp.cos(theta), r * jnp.sin(theta)], axis=0)
    else:  # odd block rows: plain cos-only Box-Muller (trace-time branch)
        u1 = 1.0 - _uniform01((tb, d))
        u2 = _uniform01((tb, d))
        eps = jnp.sqrt(-2.0 * jnp.log(u1)) * jnp.cos((2.0 * math.pi) * u2)

    mu = mu_ref[...].astype(jnp.float32)
    std = jnp.exp(0.5 * logvar_ref[...].astype(jnp.float32))
    out_ref[...] = (mu + eps * std).astype(out_ref.dtype)


def _reparam_eps_kernel(mu_ref, logvar_ref, eps_ref, out_ref):
    """Portable path: eps is an explicit streamed input (works everywhere)."""
    mu = mu_ref[...].astype(jnp.float32)
    std = jnp.exp(0.5 * logvar_ref[...].astype(jnp.float32))
    eps = eps_ref[...].astype(jnp.float32)
    out_ref[...] = (mu + eps * std).astype(out_ref.dtype)


def reparameterize(mu, logvar, seed=0, *, training=True, block_rows=2048,
                   out_dtype=None, use_hw_prng=None):
    """z = mu + N(0,1)*exp(0.5*logvar) when training, else mu.

    block_rows: batch tile.  Default 2048 rows (2 MiB/block at D=256): for
    B <= 2048 the whole array is a single block (grid=(1,)), otherwise blocks
    are rounded to a multiple of 16 rows (bf16 (16,128) tile minimum, and keeps
    the Box-Muller half-block sublane aligned).  vmem_limit_bytes is raised on
    the TPU path so 3 streams x 2 buffers + elementwise temporaries fit even on
    v5e's 16 MiB scoped default.  Pass out_dtype=jnp.bfloat16 (and/or bf16
    mu/logvar, upcast in-kernel) to halve streamed bytes on v6e/v7x.
    """
    if not training:
        return mu
    B, D = mu.shape
    out_dtype = jnp.dtype(mu.dtype) if out_dtype is None else jnp.dtype(out_dtype)
    if use_hw_prng is None:
        # Hardware PRNG primitives only lower under Mosaic (real TPU backend).
        use_hw_prng = jax.default_backend() == "tpu"

    if B <= block_rows:
        TB = B                                   # single full-array block
    else:
        TB = max(16, (min(block_rows, B) // 16) * 16)
    grid = (pl.cdiv(B, TB),)

    if use_hw_prng:
        seed_arr = jnp.atleast_1d(jnp.asarray(seed, dtype=jnp.int32))
        return pl.pallas_call(
            _reparam_hw_kernel,
            out_shape=jax.ShapeDtypeStruct((B, D), out_dtype),
            grid_spec=pltpu.PrefetchScalarGridSpec(
                num_scalar_prefetch=1,           # seed lands in SMEM
                grid=grid,
                in_specs=[
                    pl.BlockSpec((TB, D), lambda i, seed: (i, 0)),
                    pl.BlockSpec((TB, D), lambda i, seed: (i, 0)),
                ],
                out_specs=pl.BlockSpec((TB, D), lambda i, seed: (i, 0)),
            ),
            compiler_params=pltpu.CompilerParams(
                dimension_semantics=("parallel",),
                vmem_limit_bytes=40 * 1024 * 1024,
            ),
        )(seed_arr, mu, logvar)

    # Portable fallback (CPU / interpret mode): draw eps with jax.random in the
    # wrapper and fuse the elementwise math in the same tiled Pallas kernel.
    eps = jax.random.normal(jax.random.PRNGKey(int(seed)), (B, D),
                            dtype=jnp.float32)
    return pl.pallas_call(
        _reparam_eps_kernel,
        out_shape=jax.ShapeDtypeStruct((B, D), out_dtype),
        grid=grid,
        in_specs=[
            pl.BlockSpec((TB, D), lambda i: (i, 0)),
            pl.BlockSpec((TB, D), lambda i: (i, 0)),
            pl.BlockSpec((TB, D), lambda i: (i, 0)),
        ],
        out_specs=pl.BlockSpec((TB, D), lambda i: (i, 0)),
        compiler_params=pltpu.CompilerParams(
            dimension_semantics=("parallel",)),
    )(mu, logvar, eps)


# --------------------------------------------------------------------------
# Model wrapper (mirrors the PyTorch module's structure)
# --------------------------------------------------------------------------
class PallasModel:
    def __init__(self, number_components, input_size, key):
        self.number_components = number_components
        self.input_size = input_size
        D = 1
        for s in input_size:
            D *= s
        self.D = D
        # add_pseudoinputs(): normal_init(linear, pseudoinputs_mean, pseudoinputs_std)
        # Weight stored lane-dense as (K, D) (== W^T of the PyTorch (D, K)
        # layout) so no per-call transpose is needed.
        pseudoinputs_mean, pseudoinputs_std = 0.05, 0.01
        self.w_means = (pseudoinputs_mean
                        + pseudoinputs_std
                        * jax.random.normal(key, (number_components, D),
                                            dtype=jnp.float32))
        # Kept only for structural parity with the reference module; the
        # identity matmul it fed is folded away (I_K @ W^T == W^T).
        self.idle_input = jnp.eye(number_components, dtype=jnp.float32)
        self._pseudoinputs_cache = None

    def get_pseudoinputs(self):
        # Pseudoinputs only change when the weight changes -> compute once.
        if self._pseudoinputs_cache is None:
            self._pseudoinputs_cache = pseudoinputs(self.w_means)
        return self._pseudoinputs_cache

    def reparameterize(self, mu, logvar, seed=0, training=True, **kw):
        return reparameterize(mu, logvar, seed, training=training, **kw)

    def calculate_loss(self):
        return 0.0

    def calculate_likelihood(self):
        return 0.0

    def calculate_lower_bound(self):
        return 0.0

    def forward(self, x):
        # Reference forward() returns the Python float 0.0 regardless of x.
        return 0.0


if __name__ == "__main__":
    key = jax.random.PRNGKey(0)
    k_w, k_x, k_mu, k_lv = jax.random.split(key, 4)

    number_components = 8
    input_size = (1, 16, 16)          # prod = 256 (lane-dense: 2 x 128)
    B, D = 16, 256

    model = PallasModel(number_components, input_size, k_w)

    # Example NCHW-style input (ignored by forward, as in the reference).
    x = jax.random.normal(k_x, (B,) + input_size, dtype=jnp.float32)

    # Hot-path 1: pseudoinput generation (VPU clamp of the weight, cached).
    pseudo = jax.block_until_ready(model.get_pseudoinputs())
    pseudo_ref = jnp.clip(model.w_means, 0.0, 1.0)
    assert pseudo.shape == (number_components, D)
    assert jnp.allclose(pseudo, pseudo_ref, atol=1e-6)

    # Hot-path 2: reparameterization (single full-array block here, grid=(1,)).
    mu = jax.random.normal(k_mu, (B, D), dtype=jnp.float32)
    logvar = jax.random.normal(k_lv, (B, D), dtype=jnp.float32) * 0.1
    z = jax.block_until_ready(
        model.reparameterize(mu, logvar, seed=1234, training=True))
    assert z.shape == (B, D)
    assert bool(jnp.all(jnp.isfinite(z)))

    # Statistical sanity check on the implied noise eps = (z - mu) / std.
    eps_implied = (z - mu) / jnp.exp(0.5 * logvar)
    m = float(jnp.mean(eps_implied))
    s = float(jnp.std(eps_implied))
    assert abs(m) < 0.2 and abs(s - 1.0) < 0.2, (m, s)

    # Determinism: same seed -> identical draw.
    z2 = jax.block_until_ready(
        model.reparameterize(mu, logvar, seed=1234, training=True))
    assert jnp.array_equal(z, z2)

    # Eval branch returns mu unchanged (matches reference).
    z_eval = model.reparameterize(mu, logvar, seed=0, training=False)
    assert jnp.array_equal(z_eval, mu)

    # forward() semantics: exactly 0.0, matching the PyTorch module.
    out = model.forward(x)
    assert out == 0.0

    print("KERNEL_OK")
</pallas_src>

<mosaic_0001>
module attributes {stable_mosaic.version = 11 : i64} {
  func.func @_pseudoinputs_kernel(%arg0: memref<8x256xf32, #tpu.memory_space<vmem>>, %arg1: memref<8x256xf32, #tpu.memory_space<vmem>>) attributes {dimension_semantics = [], scalar_prefetch = 0 : i64, scratch_operands = 0 : i64, tpu.core_type = #tpu.core_type<tc>} {
    %c0 = arith.constant 0 : index
    %c0_0 = arith.constant 0 : index
    %0 = vector.load %arg0[%c0, %c0_0] : memref<8x256xf32, #tpu.memory_space<vmem>>, vector<8x256xf32>
    %cst = arith.constant 0.000000e+00 : f32
    %cst_1 = arith.constant 1.000000e+00 : f32
    %1 = vector.broadcast %cst : f32 to vector<8x256xf32>
    %2 = arith.maximumf %1, %0 : vector<8x256xf32>
    %3 = vector.broadcast %cst_1 : f32 to vector<8x256xf32>
    %4 = arith.minimumf %3, %2 : vector<8x256xf32>
    %c0_2 = arith.constant 0 : index
    %c0_3 = arith.constant 0 : index
    %5 = vector.load %arg1[%c0_2, %c0_3] : memref<8x256xf32, #tpu.memory_space<vmem>>, vector<8x256xf32>
    tpu.vector_store %arg1[%c0_2, %c0_3], %4 {strides = array<i32>} : memref<8x256xf32, #tpu.memory_space<vmem>>, vector<8x256xf32>,
    return
  }
}

</mosaic_0001>

<bundles_post_ra>
// kernel: tpu_custom_call.1
= control target key start
LH: loop header
LB: loop body
LE: loop exit
PB: predicated region body
PF: predicated region fallthrough
CT: control target
= control target key end

     0   :  { %6 = vsyncpa [#allocation3], 0  ;;  %s130_s0 = inlined_call_operand.hbm [shape: f32[8,256], index: 0, kind: input, shape index: {}]   ;;  %s131_s1 = inlined_call_operand.hbm [shape: f32[8,256], index: 1, kind: output, shape index: {}]  }
   0x1   :  { %7 = vsyncpa [#allocation4], 0  ;;  %s94_s6 = smov [#allocation2]   ;;  %s46_s10 = scalar_lea.hbm %s130_s0, 256 }
   0x2   :  { %s14_s7 = sshll.u32 %s94_s6, 4  ;;  %p47_p0 = scmp.ne.s32.totalorder %s130_s0, %s46_s10  ;;  %s15_s7 = int_to_ptr.vmem [resolvable:$true] %s14_s7 }
   0x3   :  { %p50_p1 = scmp.lt.u32.totalorder %s46_s10, %s130_s0 }
   0x5   :  { %p52_p2 = pnand %p50_p1, %p47_p0 }
   0x7   :  { %55 = shalt.err (!%p52_p2)
}
   0x8   :  { %s56_s15 = scalar_lea.vmem %s15_s7, 256  ;;  %p61_p4 = scmp.lt.s32.totalorder %s15_s7, %s15_s7 }
   0x9   :  { %p57_p3 = scmp.ne.s32.totalorder %s15_s7, %s56_s15  ;;  %p62_p5 = scmp.lt.s32.totalorder %s56_s15, %s56_s15 }
   0xb   :  { %p63_p6 = por %p62_p5, %p61_p4 }
   0xd   :  { %p64_p7 = pnand %p63_p6, %p57_p3 }
   0xf   :  { %67 = shalt.err (!%p64_p7)
}
  0x10   :  { %17 = dma.hbm_to_vmem [thread:$0]  %s130_s0, 256, %s15_s7, [#allocation3]  }
  0x11   :  { %90 = dma.done.wait [#allocation3], 256  }
  0x12   :  { %91 = vsyncadd [#allocation3], 4294967040  ;;  %v21_v0 = vld [vmem:[#allocation2] sm:$0xff]  ;;  %v22_v1 = vld [vmem:[#allocation2 + $0x8] sm:$0xff]  ;;  %s95_s18 = smov [#allocation5]  }
  0x13   :  { %s35_s19 = sshll.u32 %s95_s18, 4  ;;  %v23_v2 = vmax.f32 %v21_v0, 0.0  ;;  %v24_v3 = vmax.f32 %v22_v1, 0.0  ;;  %s36_s19 = int_to_ptr.vmem [resolvable:$true] %s35_s19 }
  0x14   :  { %s68_s20 = scalar_lea.vmem %s36_s19, 256  ;;  %p73_p9 = scmp.lt.s32.totalorder %s36_s19, %s36_s19 }
  0x15   :  { %v25_v4 = vmin.f32 %v23_v2, 1.0  ;;  %v26_v5 = vmin.f32 %v24_v3, 1.0  ;;  %p69_p8 = scmp.ne.s32.totalorder %s36_s19, %s68_s20  ;;  %p74_p10 = scmp.lt.s32.totalorder %s68_s20, %s68_s20 }
  0x17   :  { %27 = vst [vmem:[#allocation5] sm:$0xff] %v25_v4  ;;  %28 = vst [vmem:[#allocation5 + $0x8] sm:$0xff] %v26_v5  ;;  %p75_p11 = por %p74_p10, %p73_p9 }
  0x19   :  { %p76_p12 = pnand %p75_p11, %p69_p8 }
  0x1b   :  { %79 = shalt.err (!%p76_p12)
}
  0x1c   :  { %s80_s22 = scalar_lea.hbm %s131_s1, 256 }
  0x1d   :  { %p81_p13 = scmp.ne.s32.totalorder %s131_s1, %s80_s22  ;;  %p84_p0 = scmp.lt.u32.totalorder %s80_s22, %s131_s1 }
  0x1f   :  { %p86_p1 = pnand %p84_p0, %p81_p13 }
  0x21   :  { %89 = shalt.err (!%p86_p1)
}
  0x22   :  { %38 = dma.vmem_to_hbm [thread:$0]  %s36_s19, 256, %s131_s1, [#allocation4]  }
  0x23   :  { %92 = dma.done.wait [#allocation4], 256  }
  0x24   :  { %93 = vsyncadd [#allocation4], 4294967040 }
  0x25   :  { %42 = vsyncpa [#allocation3], 1 }
  0x26   :  { %43 = vsyncpa [#allocation4], 1 }

</bundles_post_ra>
